<compile_context>
chip_gen: v5e
topology: v5e:2x2
jax: 0.10.0
libtpu: 0.0.40
codegen_flags: <defaults>
</compile_context>

<pallas_src>
import functools

import jax
import jax.numpy as jnp
from jax.experimental import pallas as pl
from jax.experimental.pallas import tpu as pltpu


def critic_mlp_kernel(obs_ref, w1_ref, b1_ref, w2_ref, b2_ref, w3_ref, b3_ref, out_ref,
                      *, precision):
    """Whole-MLP hot path: three matmuls + bias adds + ReLU, all in VMEM.

    MXU operands use the weight dtype (bf16 fast path / f32 path); accumulation is
    always f32 (preferred_element_type); bias add / ReLU stay in f32.
    """
    # Cast the obs tile to the weight dtype in-VMEM (no-op when dtypes already match).
    # Keeping the cast in-kernel avoids a separate XLA convert op over obs in HBM.
    x = obs_ref[...].astype(w1_ref.dtype)

    # layer 1: Linear + ReLU
    h = jnp.dot(x, w1_ref[...], preferred_element_type=jnp.float32, precision=precision)
    h = jnp.maximum(h + b1_ref[...], 0.0)

    # layer 2: Linear + ReLU
    h = jnp.dot(h.astype(w2_ref.dtype), w2_ref[...],
                preferred_element_type=jnp.float32, precision=precision)
    h = jnp.maximum(h + b2_ref[...], 0.0)

    # layer 3 (output): Linear + Identity
    out = jnp.dot(h.astype(w3_ref.dtype), w3_ref[...],
                  preferred_element_type=jnp.float32, precision=precision)
    out_ref[...] = (out + b3_ref[...]).astype(out_ref.dtype)


def critic_forward(obs, params, *, batch_tile=None, use_bf16=True, precision=None):
    """Critic MLP forward pass, tiled over the batch (M) dimension only."""
    w1, b1, w2, b2, w3, b3 = params
    B, obs_dim = obs.shape
    h1 = w1.shape[1]
    h2 = w2.shape[1]
    act_dim = w3.shape[1]

    if use_bf16:
        # bf16 MXU operands on every generation; biases & accumulation stay f32.
        w1, w2, w3 = (w.astype(jnp.bfloat16) for w in (w1, w2, w3))
    elif precision is None:
        # f32 path: make the MXU pass count an explicit choice (1-pass bf16 operands).
        precision = jax.lax.Precision.DEFAULT

    if batch_tile is None:
        if B <= 256:
            # Too small to split profitably: one grid step, whole problem in VMEM.
            batch_tile = B
        else:
            # >= 2 grid steps (feeds both v7x TensorCores via the "parallel" axis),
            # 256-row-aligned tiles up to 2048 rows to amortize per-step overhead.
            # v7x users with very large B can pass batch_tile=4096..8192 explicitly.
            target = min(2048, pl.cdiv(B, 2))
            batch_tile = max(256, (target // 256) * 256)

    # Ragged last block is handled by Pallas: OOB obs rows only produce OOB output
    # rows (no cross-row mixing in an MLP), and OOB output stores are masked.
    num_tiles = pl.cdiv(B, batch_tile)

    # Weights / biases are tiny: keep the full tensors resident for every grid step.
    # Constant index maps -> they are DMA'd into VMEM only once across the grid.
    full = lambda shape: pl.BlockSpec(shape, lambda i: (0, 0))

    flops = 2 * B * (obs_dim * h1 + h1 * h2 + h2 * act_dim)
    weight_bytes = sum(int(a.size) * a.dtype.itemsize for a in (w1, b1, w2, b2, w3, b3))
    bytes_accessed = (B * obs_dim * obs.dtype.itemsize   # obs read
                      + B * act_dim * 4                  # f32 output write
                      + weight_bytes)

    out = pl.pallas_call(
        functools.partial(critic_mlp_kernel, precision=precision),
        out_shape=jax.ShapeDtypeStruct((B, act_dim), jnp.float32),
        grid=(num_tiles,),
        in_specs=[
            pl.BlockSpec((batch_tile, obs_dim), lambda i: (i, 0)),  # obs tile over batch
            full((obs_dim, h1)),
            full((1, h1)),
            full((h1, h2)),
            full((1, h2)),
            full((h2, act_dim)),
            full((1, act_dim)),
        ],
        out_specs=pl.BlockSpec((batch_tile, act_dim), lambda i: (i, 0)),
        compiler_params=pltpu.CompilerParams(
            dimension_semantics=("parallel",),
        ),
        cost_estimate=pl.CostEstimate(
            flops=flops, transcendentals=0, bytes_accessed=bytes_accessed),
    )(obs, w1, b1, w2, b2, w3, b3)

    return out


def init_params(key, obs_dim, hidden_sizes, act_dim):
    """Deterministic, in-script parameter init (synthetic; not a checkpoint load)."""
    sizes = [obs_dim] + list(hidden_sizes) + [act_dim]
    params = []
    for j in range(len(sizes) - 1):
        key, kw, kb = jax.random.split(key, 3)
        fan_in = sizes[j]
        # Match nn.Linear's default U(-1/sqrt(fan_in), 1/sqrt(fan_in)) scale.
        bound = 1.0 / jnp.sqrt(jnp.float32(fan_in))
        w = jax.random.uniform(kw, (sizes[j], sizes[j + 1]), jnp.float32, -bound, bound)
        b = jax.random.uniform(kb, (1, sizes[j + 1]), jnp.float32, -bound, bound)
        params += [w, b]
    return tuple(params)


def reference_forward(obs, params):
    """Pure-JAX reference for correctness checking."""
    w1, b1, w2, b2, w3, b3 = params
    h = jnp.maximum(obs @ w1 + b1, 0.0)
    h = jnp.maximum(h @ w2 + b2, 0.0)
    return h @ w3 + b3


if __name__ == "__main__":
    # Small shapes consistent with the module's forward.
    B, obs_dim, act_dim = 16, 32, 8
    hidden_sizes = (64, 64)

    key = jax.random.PRNGKey(0)
    key_obs, key_params, key_obs2 = jax.random.split(key, 3)
    obs = jax.random.normal(key_obs, (B, obs_dim), dtype=jnp.float32)
    params = init_params(key_params, obs_dim, hidden_sizes, act_dim)

    # f32-operand path (explicit DEFAULT precision), single grid step.
    out = jax.block_until_ready(critic_forward(obs, params, use_bf16=False))
    ref = reference_forward(obs, params)
    assert out.shape == (B, act_dim)
    assert jnp.allclose(out, ref, atol=5e-3, rtol=5e-3), "mismatch vs JAX reference (f32 path)"

    # Default bf16 fast path, tiled over the batch with a ragged last block
    # (600 = 2 full 256-row tiles + one partial tile; no wrapper pad / slice).
    B2 = 600
    obs2 = jax.random.normal(key_obs2, (B2, obs_dim), dtype=jnp.float32)
    out2 = jax.block_until_ready(critic_forward(obs2, params))
    ref2 = reference_forward(obs2, params)
    assert out2.shape == (B2, act_dim)
    assert jnp.allclose(out2, ref2, atol=5e-2, rtol=5e-2), "mismatch vs JAX reference (bf16 tiled)"

    print("KERNEL_OK")
</pallas_src>

<mosaic_0001>
module attributes {stable_mosaic.version = 11 : i64} {
  func.func @critic_mlp_kernel(%arg0: i32, %arg1: memref<16x32xf32, #tpu.memory_space<vmem>>, %arg2: memref<32x64xf32, #tpu.memory_space<vmem>>, %arg3: memref<1x64xf32, #tpu.memory_space<vmem>>, %arg4: memref<64x64xf32, #tpu.memory_space<vmem>>, %arg5: memref<1x64xf32, #tpu.memory_space<vmem>>, %arg6: memref<64x8xf32, #tpu.memory_space<vmem>>, %arg7: memref<1x8xf32, #tpu.memory_space<vmem>>, %arg8: memref<16x8xf32, #tpu.memory_space<vmem>>) attributes {dimension_semantics = [#tpu.dimension_semantics<parallel>], iteration_bounds = array<i64: 1>, scalar_prefetch = 0 : i64, scratch_operands = 0 : i64, tpu.core_type = #tpu.core_type<tc>, window_params = [{transform_indices = @transform_0, window_bounds = array<i64: 16, 32>}, {pipeline_mode = #tpu.pipeline_mode<synchronous>, transform_indices = @transform_1, window_bounds = array<i64: 32, 64>}, {pipeline_mode = #tpu.pipeline_mode<synchronous>, transform_indices = @transform_2, window_bounds = array<i64: 1, 64>}, {pipeline_mode = #tpu.pipeline_mode<synchronous>, transform_indices = @transform_3, window_bounds = array<i64: 64, 64>}, {pipeline_mode = #tpu.pipeline_mode<synchronous>, transform_indices = @transform_4, window_bounds = array<i64: 1, 64>}, {pipeline_mode = #tpu.pipeline_mode<synchronous>, transform_indices = @transform_5, window_bounds = array<i64: 64, 8>}, {pipeline_mode = #tpu.pipeline_mode<synchronous>, transform_indices = @transform_6, window_bounds = array<i64: 1, 8>}, {transform_indices = @transform_7, window_bounds = array<i64: 16, 8>}]} {
    %c0 = arith.constant 0 : index
    %c0_0 = arith.constant 0 : index
    %0 = vector.load %arg1[%c0, %c0_0] : memref<16x32xf32, #tpu.memory_space<vmem>>, vector<16x32xf32>
    %c0_1 = arith.constant 0 : index
    %c0_2 = arith.constant 0 : index
    %1 = vector.load %arg2[%c0_1, %c0_2] : memref<32x64xf32, #tpu.memory_space<vmem>>, vector<32x64xf32>
    %cst = arith.constant dense<0.000000e+00> : vector<16x64xf32>
    %2 = tpu.matmul %0, %1, %cst {dimension_numbers = #tpu.dot_dimension_numbers<[1], [0], [0], [1], [0, 0, 1, 1], [], []>} : vector<16x32xf32>, vector<32x64xf32>, vector<16x64xf32> -> vector<16x64xf32>
    %c0_3 = arith.constant 0 : index
    %c0_4 = arith.constant 0 : index
    %3 = vector.load %arg3[%c0_3, %c0_4] : memref<1x64xf32, #tpu.memory_space<vmem>>, vector<1x64xf32>
    %4 = vector.broadcast %3 : vector<1x64xf32> to vector<16x64xf32>
    %5 = arith.addf %2, %4 : vector<16x64xf32>
    %cst_5 = arith.constant 0.000000e+00 : f32
    %6 = vector.broadcast %cst_5 : f32 to vector<16x64xf32>
    %7 = arith.maximumf %5, %6 : vector<16x64xf32>
    %c0_6 = arith.constant 0 : index
    %c0_7 = arith.constant 0 : index
    %8 = vector.load %arg4[%c0_6, %c0_7] : memref<64x64xf32, #tpu.memory_space<vmem>>, vector<64x64xf32>
    %cst_8 = arith.constant dense<0.000000e+00> : vector<16x64xf32>
    %9 = tpu.matmul %7, %8, %cst_8 {dimension_numbers = #tpu.dot_dimension_numbers<[1], [0], [0], [1], [0, 0, 1, 1], [], []>} : vector<16x64xf32>, vector<64x64xf32>, vector<16x64xf32> -> vector<16x64xf32>
    %c0_9 = arith.constant 0 : index
    %c0_10 = arith.constant 0 : index
    %10 = vector.load %arg5[%c0_9, %c0_10] : memref<1x64xf32, #tpu.memory_space<vmem>>, vector<1x64xf32>
    %11 = vector.broadcast %10 : vector<1x64xf32> to vector<16x64xf32>
    %12 = arith.addf %9, %11 : vector<16x64xf32>
    %cst_11 = arith.constant 0.000000e+00 : f32
    %13 = vector.broadcast %cst_11 : f32 to vector<16x64xf32>
    %14 = arith.maximumf %12, %13 : vector<16x64xf32>
    %c0_12 = arith.constant 0 : index
    %c0_13 = arith.constant 0 : index
    %15 = vector.load %arg6[%c0_12, %c0_13] : memref<64x8xf32, #tpu.memory_space<vmem>>, vector<64x8xf32>
    %cst_14 = arith.constant dense<0.000000e+00> : vector<16x8xf32>
    %16 = tpu.matmul %14, %15, %cst_14 {dimension_numbers = #tpu.dot_dimension_numbers<[1], [0], [0], [1], [0, 0, 1, 1], [], []>} : vector<16x64xf32>, vector<64x8xf32>, vector<16x8xf32> -> vector<16x8xf32>
    %c0_15 = arith.constant 0 : index
    %c0_16 = arith.constant 0 : index
    %17 = vector.load %arg7[%c0_15, %c0_16] : memref<1x8xf32, #tpu.memory_space<vmem>>, vector<1x8xf32>
    %18 = vector.broadcast %17 : vector<1x8xf32> to vector<16x8xf32>
    %19 = arith.addf %16, %18 : vector<16x8xf32>
    %c0_17 = arith.constant 0 : index
    %c0_18 = arith.constant 0 : index
    %20 = vector.load %arg8[%c0_17, %c0_18] : memref<16x8xf32, #tpu.memory_space<vmem>>, vector<16x8xf32>
    tpu.vector_store %arg8[%c0_17, %c0_18], %19 {strides = array<i32>} : memref<16x8xf32, #tpu.memory_space<vmem>>, vector<16x8xf32>,
    return
  }
  func.func @transform_0(%arg0: i32) -> (i32, i32) {
    %c0_i32 = arith.constant 0 : i32
    %c0_i32_0 = arith.constant 0 : i32
    return %arg0, %c0_i32 : i32, i32
  }
  func.func @transform_1(%arg0: i32) -> (i32, i32) {
    %c0_i32 = arith.constant 0 : i32
    %c0_i32_0 = arith.constant 0 : i32
    %c0_i32_1 = arith.constant 0 : i32
    return %c0_i32, %c0_i32_0 : i32, i32
  }
  func.func @transform_2(%arg0: i32) -> (i32, i32) {
    %c0_i32 = arith.constant 0 : i32
    %c0_i32_0 = arith.constant 0 : i32
    %c0_i32_1 = arith.constant 0 : i32
    return %c0_i32, %c0_i32_0 : i32, i32
  }
  func.func @transform_3(%arg0: i32) -> (i32, i32) {
    %c0_i32 = arith.constant 0 : i32
    %c0_i32_0 = arith.constant 0 : i32
    %c0_i32_1 = arith.constant 0 : i32
    return %c0_i32, %c0_i32_0 : i32, i32
  }
  func.func @transform_4(%arg0: i32) -> (i32, i32) {
    %c0_i32 = arith.constant 0 : i32
    %c0_i32_0 = arith.constant 0 : i32
    %c0_i32_1 = arith.constant 0 : i32
    return %c0_i32, %c0_i32_0 : i32, i32
  }
  func.func @transform_5(%arg0: i32) -> (i32, i32) {
    %c0_i32 = arith.constant 0 : i32
    %c0_i32_0 = arith.constant 0 : i32
    %c0_i32_1 = arith.constant 0 : i32
    return %c0_i32, %c0_i32_0 : i32, i32
  }
  func.func @transform_6(%arg0: i32) -> (i32, i32) {
    %c0_i32 = arith.constant 0 : i32
    %c0_i32_0 = arith.constant 0 : i32
    %c0_i32_1 = arith.constant 0 : i32
    return %c0_i32, %c0_i32_0 : i32, i32
  }
  func.func @transform_7(%arg0: i32) -> (i32, i32) {
    %c0_i32 = arith.constant 0 : i32
    %c0_i32_0 = arith.constant 0 : i32
    return %arg0, %c0_i32 : i32, i32
  }
}

</mosaic_0001>

<bundles_post_ra>
// kernel: tpu_custom_call.1
= control target key start
LH: loop header
LB: loop body
LE: loop exit
PB: predicated region body
PF: predicated region fallthrough
CT: control target
= control target key end

     0   :  { %12 = vsyncpa [#allocation3], 0  ;;  %s384_s0 = inlined_call_operand.hbm [shape: f32[16,32], index: 0, kind: input, shape index: {}]   ;;  %s385_s1 = inlined_call_operand.hbm [shape: f32[32,64], index: 1, kind: input, shape index: {}]   ;;  %s386_s2 = inlined_call_operand.vmem [shape: f32[1,64], index: 2, kind: input, shape index: {}]   ;;  %s387_s3 = inlined_call_operand.vmem [shape: f32[64,64], index: 3, kind: input, shape index: {}]   ;;  %s388_s4 = inlined_call_operand.vmem [shape: f32[1,64], index: 4, kind: input, shape index: {}]   ;;  %s389_s5 = inlined_call_operand.vmem [shape: f32[64,8], index: 5, kind: input, shape index: {}]   ;;  %s390_s6 = inlined_call_operand.vmem [shape: f32[1,8], index: 6, kind: input, shape index: {}]   ;;  %s391_s7 = inlined_call_operand.vmem [shape: f32[16,8], index: 7, kind: output, shape index: {}]  }
   0x1   :  { %s18_s26 = sshll.u32 %s384_s0, 4  ;;  %s19_s26 = int_to_ptr.hbm [resolvable:$true] %s18_s26 }
   0x2   :  { %13 = vsyncpa [#allocation5], 0  ;;  %s267_s27 = smov [#allocation2]   ;;  %s31_s8 = sshll.u32 %s385_s1, 4  ;;  %s32_s8 = int_to_ptr.hbm [resolvable:$true] %s31_s8 }
   0x3   :  { %s20_s28 = sshll.u32 %s267_s27, 4  ;;  %s268_s9 = smov 128   ;;  %s21_s28 = int_to_ptr.vmem [resolvable:$true] %s20_s28 }
   0x4   :  { %s269_s10 = smov 8   ;;  %s270_s11 = smov [#allocation4]  }
   0x5   :  { %26 = dma.hbm_to_vmem [thread:$0]  %s19_s26, 256, %s21_s28, [#allocation3], %s268_s9, %s268_s9, %s269_s10  }
   0x6   :  { %s33_s12 = sshll.u32 %s270_s11, 4  ;;  %s34_s12 = int_to_ptr.vmem [resolvable:$true] %s33_s12 }
   0x7   :  { %39 = dma.hbm_to_vmem [thread:$0]  %s32_s8, 512, %s34_s12, [#allocation5], %s268_s9, %s268_s9, %s269_s10  }
   0x8   :  { %263 = dma.done.wait [#allocation3], 256  }
   0x9   :  { %264 = vsyncadd [#allocation3], 4294967040 }
   0xa   :  { %265 = dma.done.wait [#allocation5], 512  }
   0xb   :  { %266 = vsyncadd [#allocation5], 4294966784  ;;  %v63_v0 = vld [vmem:[#allocation4 + $0x18] sm:$0xff]  ;;  %v62_v1 = vld [vmem:[#allocation4 + $0x10] sm:$0xff]  ;;  %vm68_vm0 = vcmask 261120   ;;  %vm112_vm1 = vcmask 523264  }
   0xc   :  { %87 = vmatpush.msra.mxu0 %v63_v0  ;;  %v61_v2 = vld [vmem:[#allocation4 + $0x8] sm:$0xff]  ;;  %v106_v4 = vld [vmem:[%s387_s3 + $0x30] sm:$0xff]  ;;  %v105_v6 = vld [vmem:[%s387_s3 + $0x28] sm:$0xff]  ;;  %vm185_vm2 = vcmask 64512  }
   0xd   :  { %v107_v3 = vld [vmem:[%s387_s3 + $0x38] sm:$0xff]  ;;  %v60_v5 = vld [vmem:[#allocation4] sm:$0xff]  ;;  %v58_v7 = vld [vmem:[#allocation2] sm:$0xff] }
   0xe   :  { %88 = vmatpush.msra.mxu0 %v62_v1  ;;  %127 = vmatpush.msra.mxu1 %v107_v3  ;;  %v104_v8 = vld [vmem:[%s387_s3 + $0x20] sm:$0xff]  ;;  %v103_v9 = vld [vmem:[%s387_s3 + $0x18] sm:$0xff]  ;;  %v59_v10 = vld [vmem:[#allocation2 + $0x8] sm:$0xff] }
   0xf   :  { %200 = vmatpush.msra.mxu3 %v107_v3  ;;  %v102_v11 = vld [vmem:[%s387_s3 + $0x10] sm:$0xff]  ;;  %v101_v12 = vld [vmem:[%s387_s3 + $0x8] sm:$0xff]  ;;  %v100_v13 = vld [vmem:[%s387_s3] sm:$0xff] }
  0x10   :  { %89 = vmatpush.msra.mxu0 %v61_v2  ;;  %128 = vmatpush.msra.mxu1 %v106_v4  ;;  %v151_v14 = vld [vmem:[%s389_s5 + $0x38] sm:$0xff]  ;;  %v150_v15 = vld [vmem:[%s389_s5 + $0x30] sm:$0xff]  ;;  %v149_v16 = vld [vmem:[%s389_s5 + $0x28] sm:$0xff] }
  0x11   :  { %201 = vmatpush.msra.mxu3 %v106_v4  ;;  %170 = vmatpush.msra.mxu2 %v151_v14  ;;  %v148_v17 = vld [vmem:[%s389_s5 + $0x20] sm:$0xff]  ;;  %v147_v18 = vld [vmem:[%s389_s5 + $0x18] sm:$0xff]  ;;  %v146_v26 = vld [vmem:[%s389_s5 + $0x10] sm:$0xff] }
  0x12   :  { %90 = vmatpush.msra.mxu0 %v60_v5  ;;  %129 = vmatpush.msra.mxu1 %v105_v6  ;;  %v212_v19 = vld [vmem:[%s386_s2] ss:$0 sm:$0xff]  ;;  %v145_v27 = vld [vmem:[%s389_s5 + $0x8] sm:$0xff] }
  0x13   :  { %194 = vmatmul.msk.f32.vlgmr.msra.gmra.mxu0 %vm68_vm0, %v58_v7  ;;  %202 = vmatpush.msra.mxu3 %v105_v6  ;;  %v144_v28 = vld [vmem:[%s389_s5] sm:$0xff] }
  0x14   :  { %130 = vmatpush.msra.mxu1 %v104_v8  ;;  %171 = vmatpush.msra.mxu2 %v150_v15  ;;  %v213_v29 = vld [vmem:[%s388_s4] ss:$0 sm:$0xff] }
  0x15   :  { %203 = vmatpush.msra.mxu3 %v104_v8  ;;  %v214_v36 = vld [vmem:[%s390_s6] ss:$0 sm:$0xff] }
  0x16   :  { %131 = vmatpush.msra.mxu1 %v103_v9  ;;  %172 = vmatpush.msra.mxu2 %v149_v16 }
  0x17   :  { %204 = vmatpush.msra.mxu3 %v103_v9 }
  0x18   :  { %132 = vmatpush.msra.mxu1 %v102_v11  ;;  %173 = vmatpush.msra.mxu2 %v148_v17 }
  0x19   :  { %205 = vmatpush.msra.mxu3 %v102_v11 }
  0x1a   :  { %133 = vmatpush.msra.mxu1 %v101_v12  ;;  %174 = vmatpush.msra.mxu2 %v147_v18 }
  0x1b   :  { %195 = vmatmul.msk.f32.gmra.mxu0 %vm68_vm0, %v59_v10  ;;  %206 = vmatpush.msra.mxu3 %v101_v12 }
  0x1c   :  { %134 = vmatpush.msra.mxu1 %v100_v13  ;;  %175 = vmatpush.msra.mxu2 %v146_v26 }
  0x1d   :  { %207 = vmatpush.msra.mxu3 %v100_v13 }
  0x1e   :  { %176 = vmatpush.msra.mxu2 %v145_v27 }
  0x20   :  { %177 = vmatpush.msra.mxu2 %v144_v28 }
  0x90   :  { %v92_v20 = vpop.f32.mrf.mxu0 }
  0x91   :  { %v93_v21 = vadd.f32 %v212_v19, %v92_v20 }
  0x93   :  { %v98_v22 = vmax.f32 %v93_v21, 0.0 }
  0x95   :  { %196 = vmatmul.msk.f32.vlgmr.msra.gmra.mxu1 %vm112_vm1, %v98_v22 }
  0x98   :  { %v95_v23 = vpop.f32.mrf.mxu0 }
  0x99   :  { %v96_v24 = vadd.f32 %v212_v19, %v95_v23 }
  0x9b   :  { %v99_v25 = vmax.f32 %v96_v24, 0.0 }
  0x9d   :  { %197 = vmatmul.msk.f32.vlgmr.msra.gmra.mxu3 %vm112_vm1, %v99_v25 }
 0x112   :  { %v136_v30 = vpop.f32.mrf.mxu1 }
 0x113   :  { %v137_v31 = vadd.f32 %v213_v29, %v136_v30 }
 0x115   :  { %v142_v32 = vmax.f32 %v137_v31, 0.0 }
 0x117   :  { %198 = vmatmul.msk.f32.vlgmr.msra.gmra.mxu2 %vm112_vm1, %v142_v32 }
 0x120   :  { %v139_v33 = vpop.f32.mrf.mxu3 }
 0x121   :  { %v140_v34 = vadd.f32 %v213_v29, %v139_v33 }
 0x123   :  { %v143_v35 = vmax.f32 %v140_v34, 0.0 }
 0x125   :  { %199 = vmatmul.msk.f32.gmra.mxu2 %vm112_vm1, %v143_v35 }
 0x19a   :  { %v179_v37 = vpop.f32.mrf.mxu2 }
 0x19b   :  { %v180_v38 = vadd.f32 %v214_v36, %v179_v37 }
 0x19d   :  { %186 = vst.msk [vmem:[%s391_s7] sm:$0xff] %vm185_vm2, %v180_v38 }
 0x1a8   :  { %v182_v39 = vpop.f32.mrf.mxu2 }
 0x1a9   :  { %v183_v40 = vadd.f32 %v214_v36, %v182_v39 }
 0x1ab   :  { %187 = vst.msk [vmem:[%s391_s7 + $0x8] sm:$0xff] %vm185_vm2, %v183_v40 }
 0x1ac   :  { %192 = vsyncpa [#allocation3], 1 }
 0x1ad   :  { %193 = vsyncpa [#allocation5], 1 }

</bundles_post_ra>
